<compile_context>
chip_gen: v6e
topology: v6e:2x2x1
jax: 0.10.0
libtpu: 0.0.40
codegen_flags: <defaults>
</compile_context>

<pallas_src>
import jax
import jax.numpy as jnp
from jax.experimental import pallas as pl
from jax.experimental.pallas import tpu as pltpu


# ----------------------------------------------------------------------------
# Kernels
# ----------------------------------------------------------------------------
def lam_kernel(gamma_ref, x_ref, o_ref):
    """Fast path: whole (Bt, N, D) slab resident in VMEM."""
    x = x_ref[...]                                               # native dtype

    # energy[b] = q[b] @ q[b]^T ; contraction on the last dim of BOTH operands
    # (batched dot_general) -> no explicit transpose, native-dtype MXU path.
    energy = jnp.einsum('bnd,bmd->bnm', x, x,
                        preferred_element_type=jnp.float32)      # (Bt, N, N)

    # Reference computes softmax(rowmax(energy) - energy).  Softmax is
    # shift-invariant, so the stabilized logits are exp(rowmin - energy):
    # one reduction instead of two.
    row_min = jnp.min(energy, axis=-1, keepdims=True)            # (Bt, N, 1)
    e = jnp.exp(row_min - energy)                                # (Bt, N, N)
    denom = jnp.sum(e, axis=-1, keepdims=True)                   # (Bt, N, 1)
    # Exact divide (kernel is HBM-bound; the EUP approx reciprocal introduced
    # ~5e-3 output error and is not worth the precision loss).
    att = e / denom                                              # (Bt, N, N)

    # out[b] = att[b] @ value[b]; cast att to the input dtype so bf16 inputs
    # stay on the native bf16 MXU path (no-op for f32).
    out = jnp.einsum('bnm,bmd->bnd', att.astype(x.dtype), x,
                     preferred_element_type=jnp.float32)         # (Bt, N, D)

    gamma = gamma_ref[0]                                         # scalar (SMEM)
    # Full-block store; last dim D is lane-dense (multiple of 128 or == D).
    o_ref[...] = (gamma * out + x).astype(o_ref.dtype)


def lam_energy_kernel(x_ref, e_ref):
    """Fallback pass 1: accumulate energy over D chunks (grid axis 1)."""
    @pl.when(pl.program_id(1) == 0)
    def _():
        e_ref[...] = jnp.zeros_like(e_ref)
    x = x_ref[...]
    e_ref[...] += jnp.einsum('bnd,bmd->bnm', x, x,
                             preferred_element_type=jnp.float32)


def lam_apply_kernel(gamma_ref, att_ref, x_ref, o_ref):
    """Fallback pass 2: out = gamma * (att @ x_chunk) + x_chunk."""
    x = x_ref[...]
    att = att_ref[...].astype(x.dtype)
    out = jnp.einsum('bnm,bmd->bnd', att, x,
                     preferred_element_type=jnp.float32)
    gamma = gamma_ref[0]
    o_ref[...] = (gamma * out + x).astype(o_ref.dtype)


# ----------------------------------------------------------------------------
# VMEM budgeting / tiling choice
# ----------------------------------------------------------------------------
def _vmem_caps():
    """(chooser budget, compiler vmem limit cap), derived from the chip."""
    cap = 64 * 1024 * 1024                      # conservative default (v7x)
    try:
        info = pltpu.get_tpu_info()
        cap = int(getattr(info, "vmem_capacity_bytes", cap))
    except Exception:
        pass
    budget = int(cap * 0.60)                    # working-set budget for tiling
    limit_cap = int(cap * 0.78)                 # never request more than this
    return budget, limit_cap


def _block_cost_bytes(bt, N, D, elt_bytes):
    """Approx VMEM working set of one fast-path grid step (double-buffered)."""
    x_in = 2 * bt * N * D * elt_bytes           # input block, 2 buffers
    out = 2 * bt * N * D * elt_bytes            # output block, 2 buffers
    f32_tmp = bt * N * D * 4                    # f32 MXU output accumulator
    if elt_bytes < 4:
        f32_tmp += bt * N * D * 4               # promoted residual-add temp
    attn = 3 * bt * N * N * 4                   # energy + exp + att
    return x_in + out + f32_tmp + attn


def _choose_bt(B, N, D, elt_bytes, budget):
    """Largest batch tile (divisor of B) fitting budget; >=2 grid steps so
    double-buffering / megacore sharding have something to overlap, and an
    even step count is preferred (v7x has 2 TensorCores).  Returns None when
    even bt=1 does not fit (caller switches to the D-tiled fallback)."""
    min_steps = 2 if B >= 2 else 1
    feasible = [bt for bt in range(1, B + 1)
                if B % bt == 0
                and B // bt >= min_steps
                and _block_cost_bytes(bt, N, D, elt_bytes) <= budget]
    if not feasible:
        return None
    best = max(feasible)
    even = [bt for bt in feasible if (B // bt) % 2 == 0]
    if even:
        best_even = max(even)
        if best_even * 2 >= best:               # only trade down a little for evenness
            return best_even
    return best


def _choose_dk(N, D, elt_bytes, budget, bt=1):
    """Largest multiple-of-128 divisor of D whose pass-2 working set fits."""
    best = None
    for dk in range(128, D + 1, 128):
        if D % dk:
            continue
        cost = (2 * bt * N * dk * elt_bytes     # x chunk, 2 buffers
                + 2 * bt * N * dk * elt_bytes   # out chunk, 2 buffers
                + 2 * bt * N * dk * 4           # f32 temporaries
                + 4 * bt * N * N * 4)           # att (2 buffers) + energy
        if cost <= budget:
            best = dk
    return best if best is not None else 128


def _vmem_limit(cost, limit_cap):
    return min(limit_cap, max(int(cost * 1.25) + (4 << 20), 32 << 20))


# ----------------------------------------------------------------------------
# Forward wrappers
# ----------------------------------------------------------------------------
def _lam_forward_d_tiled(x_flat, gamma, N, D, elt_bytes, budget, limit_cap):
    """Two-pass, D-chunked path: VMEM capped at O(N^2 + Dk*N) per step."""
    B = x_flat.shape[0]
    bt = 1
    dk = _choose_dk(N, D, elt_bytes, budget, bt)
    grid = (B // bt, D // dk)

    cost = (4 * bt * N * dk * elt_bytes + 2 * bt * N * dk * 4
            + 4 * bt * N * N * 4)
    limit = _vmem_limit(cost, limit_cap)

    energy = pl.pallas_call(
        lam_energy_kernel,
        out_shape=jax.ShapeDtypeStruct((B, N, N), jnp.float32),
        grid_spec=pltpu.PrefetchScalarGridSpec(
            num_scalar_prefetch=0,
            grid=grid,
            in_specs=[pl.BlockSpec((bt, N, dk), lambda b, k: (b, 0, k))],
            out_specs=pl.BlockSpec((bt, N, N), lambda b, k: (b, 0, 0)),
        ),
        compiler_params=pltpu.CompilerParams(
            dimension_semantics=("parallel", "arbitrary"),
            vmem_limit_bytes=limit,
        ),
    )(x_flat)

    # Softmax on the tiny (B, N, N) tensor in plain JAX (matches reference).
    att = jax.nn.softmax(
        jnp.max(energy, axis=-1, keepdims=True) - energy, axis=-1)
    att = att.astype(jnp.float32)

    out_flat = pl.pallas_call(
        lam_apply_kernel,
        out_shape=jax.ShapeDtypeStruct((B, N, D), x_flat.dtype),
        grid_spec=pltpu.PrefetchScalarGridSpec(
            num_scalar_prefetch=0,
            grid=grid,
            in_specs=[
                pl.BlockSpec(memory_space=pltpu.MemorySpace.SMEM),   # gamma (1,)
                pl.BlockSpec((bt, N, N), lambda b, k: (b, 0, 0)),    # att
                pl.BlockSpec((bt, N, dk), lambda b, k: (b, 0, k)),   # x chunk
            ],
            out_specs=pl.BlockSpec((bt, N, dk), lambda b, k: (b, 0, k)),
        ),
        compiler_params=pltpu.CompilerParams(
            dimension_semantics=("parallel", "parallel"),
            vmem_limit_bytes=limit,
        ),
    )(gamma, att, x_flat)
    return out_flat


def lam_forward(x, gamma, *, vmem_budget_bytes=None, force_d_tiled=False):
    """x: (B, N, C, H, W), gamma: (1,) -> (B, N*C, H, W)"""
    B, N, C, H, W = x.shape
    D = C * H * W
    x_flat = x.reshape(B, N, D)
    elt_bytes = jnp.dtype(x.dtype).itemsize

    budget, limit_cap = _vmem_caps()
    if vmem_budget_bytes is not None:
        budget = vmem_budget_bytes

    bt = None if force_d_tiled else _choose_bt(B, N, D, elt_bytes, budget)

    if bt is None:
        if D % 128 == 0 and D >= 256:
            out_flat = _lam_forward_d_tiled(
                x_flat, gamma, N, D, elt_bytes, budget, limit_cap)
            return out_flat.reshape(B, N * C, H, W)
        # TODO(synk): D not a multiple of 128 -> no legal D-chunked BlockSpec;
        # fall back to a single-batch block and rely on the raised VMEM limit.
        bt = 1

    cost = _block_cost_bytes(bt, N, D, elt_bytes)
    limit = _vmem_limit(cost, limit_cap)
    grid = (B // bt,)

    out_flat = pl.pallas_call(
        lam_kernel,
        out_shape=jax.ShapeDtypeStruct((B, N, D), x.dtype),
        grid_spec=pltpu.PrefetchScalarGridSpec(
            num_scalar_prefetch=0,
            grid=grid,
            in_specs=[
                pl.BlockSpec(memory_space=pltpu.MemorySpace.SMEM),  # gamma (1,)
                pl.BlockSpec((bt, N, D), lambda b: (b, 0, 0)),      # x slab
            ],
            out_specs=pl.BlockSpec((bt, N, D), lambda b: (b, 0, 0)),
        ),
        compiler_params=pltpu.CompilerParams(
            dimension_semantics=("parallel",),
            vmem_limit_bytes=limit,
        ),
    )(gamma, x_flat)

    return out_flat.reshape(B, N * C, H, W)


def lam_reference(x, gamma):
    """Pure-JAX reference mirroring the PyTorch module."""
    B, N, C, H, W = x.shape
    q = x.reshape(B, N, -1)
    energy = jnp.einsum('bnd,bmd->bnm', q, q)
    att = jnp.max(energy, axis=-1, keepdims=True) - energy
    att = jax.nn.softmax(att, axis=-1)
    out = jnp.einsum('bnm,bmd->bnd', att, q)
    out = out.reshape(B, N, C, H, W)
    y = gamma[0] * out + x
    return y.reshape(B, N * C, H, W)


if __name__ == "__main__":
    key = jax.random.PRNGKey(0)
    B, N, C, H, W = 2, 8, 4, 16, 16
    x = jax.random.normal(key, (B, N, C, H, W), dtype=jnp.float32)

    # nn.Parameter(torch.zeros(1)) init, plus a nonzero gamma to exercise
    # the attention/residual path.
    gamma_zero = jnp.zeros((1,), dtype=jnp.float32)
    gamma_test = jnp.array([0.5], dtype=jnp.float32)

    for gamma in (gamma_zero, gamma_test):
        y = jax.block_until_ready(lam_forward(x, gamma))
        y_ref = lam_reference(x, gamma)
        assert y.shape == (B, N * C, H, W)
        assert jnp.allclose(y, y_ref, atol=2e-3, rtol=2e-3), (
            float(jnp.max(jnp.abs(y - y_ref))))

    # Also exercise the D-tiled two-pass fallback (chunked energy accumulation
    # + chunked apply) by forcing a tiny budget so it picks Dk < D.
    y = jax.block_until_ready(
        lam_forward(x, gamma_test, force_d_tiled=True,
                    vmem_budget_bytes=64 * 1024))
    y_ref = lam_reference(x, gamma_test)
    assert y.shape == (B, N * C, H, W)
    assert jnp.allclose(y, y_ref, atol=2e-3, rtol=2e-3), (
        float(jnp.max(jnp.abs(y - y_ref))))

    print("KERNEL_OK")
</pallas_src>

<mosaic_0001>
module attributes {stable_mosaic.version = 11 : i64} {
  func.func @lam_kernel(%arg0: i32, %arg1: memref<1xf32, #tpu.memory_space<smem>>, %arg2: memref<1x8x1024xf32, #tpu.memory_space<vmem>>, %arg3: memref<1x8x1024xf32, #tpu.memory_space<vmem>>) attributes {dimension_semantics = [#tpu.dimension_semantics<parallel>], iteration_bounds = array<i64: 2>, scalar_prefetch = 0 : i64, scratch_operands = 0 : i64, tpu.core_type = #tpu.core_type<tc>, window_params = [{transform_indices = @transform_0, window_bounds = array<i64: 1>}, {transform_indices = @transform_1, window_bounds = array<i64: 1, 8, 1024>}, {transform_indices = @transform_2, window_bounds = array<i64: 1, 8, 1024>}]} {
    %c0 = arith.constant 0 : index
    %c0_0 = arith.constant 0 : index
    %c0_1 = arith.constant 0 : index
    %0 = vector.load %arg2[%c0, %c0_0, %c0_1] : memref<1x8x1024xf32, #tpu.memory_space<vmem>>, vector<1x8x1024xf32>
    "tpu.trace_start"() <{level = 10 : i32, message = "bnd,bmd->bnm"}> : () -> ()
    %cst = arith.constant dense<0.000000e+00> : vector<1x8x8xf32>
    %1 = tpu.matmul %0, %0, %cst {dimension_numbers = #tpu.dot_dimension_numbers<[2], [2], [1], [1], [0, 0, 0, 1, 1, 1], [0], [0]>} : vector<1x8x1024xf32>, vector<1x8x1024xf32>, vector<1x8x8xf32> -> vector<1x8x8xf32>
    "tpu.trace_stop"() : () -> ()
    %cst_2 = arith.constant dense<0x7F800000> : vector<1x8xf32>
    %2 = vector.multi_reduction <minimumf>, %1, %cst_2 [2] : vector<1x8x8xf32> to vector<1x8xf32>
    %3 = vector.shape_cast %2 : vector<1x8xf32> to vector<1x8x1xf32>
    %4 = vector.broadcast %3 : vector<1x8x1xf32> to vector<1x8x8xf32>
    %5 = arith.subf %4, %1 : vector<1x8x8xf32>
    %6 = math.exp %5 : vector<1x8x8xf32>
    %cst_3 = arith.constant dense<0.000000e+00> : vector<1x8xf32>
    %7 = vector.multi_reduction <add>, %6, %cst_3 [2] : vector<1x8x8xf32> to vector<1x8xf32>
    %8 = vector.shape_cast %7 : vector<1x8xf32> to vector<1x8x1xf32>
    %9 = vector.broadcast %8 : vector<1x8x1xf32> to vector<1x8x8xf32>
    %10 = arith.divf %6, %9 : vector<1x8x8xf32>
    "tpu.trace_start"() <{level = 10 : i32, message = "bnm,bmd->bnd"}> : () -> ()
    %cst_4 = arith.constant dense<0.000000e+00> : vector<1x8x1024xf32>
    %11 = tpu.matmul %10, %0, %cst_4 {dimension_numbers = #tpu.dot_dimension_numbers<[2], [1], [1], [2], [0, 0, 0, 1, 1, 2], [0], [0]>} : vector<1x8x8xf32>, vector<1x8x1024xf32>, vector<1x8x1024xf32> -> vector<1x8x1024xf32>
    "tpu.trace_stop"() : () -> ()
    %c0_5 = arith.constant 0 : index
    %12 = memref.load %arg1[%c0_5] : memref<1xf32, #tpu.memory_space<smem>>
    %13 = vector.broadcast %12 : f32 to vector<1x8x1024xf32>
    %14 = arith.mulf %13, %11 : vector<1x8x1024xf32>
    %15 = arith.addf %14, %0 : vector<1x8x1024xf32>
    %c0_6 = arith.constant 0 : index
    %c0_7 = arith.constant 0 : index
    %c0_8 = arith.constant 0 : index
    %16 = vector.load %arg3[%c0_6, %c0_7, %c0_8] : memref<1x8x1024xf32, #tpu.memory_space<vmem>>, vector<1x8x1024xf32>
    tpu.vector_store %arg3[%c0_6, %c0_7, %c0_8], %15 {strides = array<i32>} : memref<1x8x1024xf32, #tpu.memory_space<vmem>>, vector<1x8x1024xf32>,
    return
  }
  func.func @transform_0(%arg0: i32) -> i32 {
    %c0_i32 = arith.constant 0 : i32
    %c0_i32_0 = arith.constant 0 : i32
    return %c0_i32 : i32
  }
  func.func @transform_1(%arg0: i32) -> (i32, i32, i32) {
    %c0_i32 = arith.constant 0 : i32
    %c0_i32_0 = arith.constant 0 : i32
    %c0_i32_1 = arith.constant 0 : i32
    return %arg0, %c0_i32, %c0_i32_0 : i32, i32, i32
  }
  func.func @transform_2(%arg0: i32) -> (i32, i32, i32) {
    %c0_i32 = arith.constant 0 : i32
    %c0_i32_0 = arith.constant 0 : i32
    %c0_i32_1 = arith.constant 0 : i32
    return %arg0, %c0_i32, %c0_i32_0 : i32, i32, i32
  }
}

</mosaic_0001>

<bundles_post_ra>
// kernel: tpu_custom_call.1
= control target key start
LH: loop header
LB: loop body
LE: loop exit
PB: predicated region body
PF: predicated region fallthrough
CT: control target
= control target key end

     0   :  { %s1250_s0 = inlined_call_operand.<no memory space> [shape: f32[1], index: 0, kind: input, shape index: {}]   ;;  %s1251_s1 = inlined_call_operand.hbm [shape: f32[2,8,1024], index: 1, kind: input, shape index: {}]   ;;  %s1252_s2 = inlined_call_operand.hbm [shape: f32[2,8,1024], index: 2, kind: output, shape index: {}]  }
   0x1   :  { %7 = sst [smem:[#allocation2]] %s1250_s0 }
   0x2   :  { %8 = vsyncpa [#allocation4], 0 }
   0x3   :  { %10 = vsyncpa [#allocation4 + $0x1], 0 }
   0x4   :  { %11 = vsyncpa [#allocation5], 0 }
   0x5   :  { %13 = vsyncpa [#allocation5 + $0x1], 0  ;;  %s1045_s11 = smov 0   ;;  %s1047_s12 = smov 0  }
   0x6   :  { %s1049_s13 = smov 0   ;;  %s1051_s14 = smov 0  }
   0x7 LB: > { %s1066_s0 = sadd.s32 4294967295, %s1022_s14   ;;  %s859_s15 = sadd.s32 4294967294, %s1022_s14   ;;  %s1022_s14 = sphi %s1051_s14, %s1269_s14   ;;  %s1018_s13 = sphi %s1049_s13, %s1268_s13   ;;  %s1014_s12 = sphi %s1047_s12, %s1267_s12   ;;  %s1010_s11 = sphi %s1045_s11, %s1266_s11  }
   0x8   : > { %s1070_s16 = sadd.s32 1, %s1022_s14   ;;  %s47_s17 = sadd.s32 1, %s1018_s13 }
   0x9   : > { %s44_s18 = ssub.s32 %s1022_s14, %s1070_s16  ;;  %p54_p0 = scmp.ne.s32.totalorder %s1018_s13, %s1014_s12 }
   0xa   : > { %p45_p1 = scmp.eq.s32.totalorder %s44_s18, 0  ;;  %p55_p2 = scmp.eq.s32.totalorder %s1022_s14, 0 }
   0xb   : > { %p60_p3 = scmp.ne.s32.totalorder %s1014_s12, %s1010_s11  ;;  %p61_p4 = scmp.eq.s32.totalorder %s1066_s0, 0 }
   0xc   : > { %s1082_s19 = scalar_select %p45_p1, %s1018_s13, %s47_s17  }
   0xd   : > { %p1084_p5 = por %p55_p2, %p54_p0  ;;  %p1088_p6 = por %p61_p4, %p60_p3 }
   0xe   : > { %p84_p7 = scmp.eq.s32.totalorder %s1066_s0, 1  ;;  %p90_p8 = scmp.eq.s32.totalorder %s859_s15, 1 }
   0xf   : > { %s1256_s21 = scalar_select %p1088_p6, 1, 0 }
  0x10   : > { %p891_p10 = scmp.lt.s32.totalorder %s1022_s14, 2  ;;  %p1095_p11 = por %p84_p7, %p54_p0 }
  0x11   : > { %p1099_p12 = por %p90_p8, %p60_p3  ;;  %s113_s24 = sand.u32 1, %s1018_s13  }
  0x12   : > { %s1257_s22 = scalar_select %p1095_p11, 1, 0 }
  0x13   : > { %s1258_s23 = scalar_select %p1099_p12, 1, 0 }
  0x14   : > { %s877_s25 = sshll.u32 %s1022_s14, 10  ;;  %s862_s26 = sshll.u32 %s113_s24, 6 }
  0x15   : > { %s1108_s29 = scalar_lea.hbm %s1251_s1, %s877_s25  ;;  %s117_s30 = scalar_lea.vmem [#allocation3], %s862_s26 }
  0x16   : > { %s125_s3 = sshll.u32 %s117_s30, 4  ;;  %p1112_p13 = pnand %p891_p10, %p1084_p5  ;;  %s1116_s3 = int_to_ptr.vmem [resolvable:$true] %s125_s3 }
  0x17   : > { %s114_s5 = scalar_lea.sflag [#allocation4], %s113_s24  ;;  %s930_s6 = scalar_lea.hbm %s1108_s29, 1024 }
  0x18   : > { %p931_p2 = scmp.ne.s32.totalorder %s1108_s29, %s930_s6  ;;  %p932_p3 = pneg %p1112_p13 }
  0x19   : > { %s935_s9 = scalar_lea.hbm %s1251_s1, 2048  ;;  %p936_p5 = scmp.lt.s32.totalorder %s1108_s29, %s1251_s1 }
  0x1a   : > { %p933_p4 = pnand %p932_p3, %p931_p2  ;;  %p937_p8 = scmp.lt.s32.totalorder %s935_s9, %s930_s6 }
  0x1c   : > { %p934_p7 = pneg %p933_p4  ;;  %p938_p10 = por %p937_p8, %p936_p5 }
  0x1e   : > { %p939_p9 = pnand %p938_p10, %p934_p7 }
  0x20   : > { %942 = shalt.err (!%p939_p9)
}
  0x21   : > { %s943_s17 = scalar_lea.vmem %s1116_s3, 1024  ;;  %s1024_s18 = smov [#allocation3]  }
  0x22   : > { %p944_p0 = scmp.ne.s32.totalorder %s1116_s3, %s943_s17  ;;  %s948_s20 = sshll.u32 %s1024_s18, 4  ;;  %s949_s20 = int_to_ptr.vmem [resolvable:$false] %s948_s20 }
  0x23   : > { %s950_s24 = scalar_lea.vmem %s949_s20, 2048  ;;  %p951_p4 = scmp.lt.s32.totalorder %s1116_s3, %s949_s20 }
  0x24   : > { %p946_p1 = pnand %p944_p0, %p932_p3  ;;  %p952_p12 = scmp.lt.s32.totalorder %s950_s24, %s943_s17 }
  0x26   : > { %p947_p2 = pneg %p946_p1  ;;  %p953_p11 = por %p952_p12, %p951_p4 }
  0x28   : > { %p954_p6 = pnand %p953_p11, %p947_p2 }
  0x2a   : > { %957 = shalt.err (!%p954_p6)
}
  0x2b   : > { %886 = dma.hbm_to_vmem [thread:$0]  (!%p1112_p13), %s1108_s29, 1024, %s1116_s3, %s114_s5  }
  0x2c   : > { %p1260_p9 = scmp.lt.s32.totalorder %s1022_s14, 3  ;;  %p1261_p7 = scmp.ge.s32.totalorder %s1022_s14, 1 }
  0x2e   : > { %p131_p0 = pnand %p1261_p7, %p1260_p9 }
  0x2f   : > { %s1143_s25 = sand.u32 (!%p131_p0), 1, %s1014_s12   ;;  %p1262_p6 = scmp.ne.s32.totalorder (!%p131_p0), %s1256_s21, 0 }
  0x30   : > { %134 = sbr.rel (%p131_p0) target bundleno = 788 (0x314), region = 28  ;;  %s866_s26 = sshll.u32 (!%p131_p0), %s1143_s25, 6 }
  0x31   : > { %s137_s27 = scalar_lea.sflag (!%p131_p0), [#allocation4], %s1143_s25  ;;  %s140_s28 = scalar_lea.vmem (!%p131_p0), [#allocation3], %s866_s26 }
  0x35   : > { %1001 = dma.done.wait (%p1262_p6), %s137_s27, 1024  }
  0x36   : > { %1003 = vsyncadd (%p1262_p6), %s137_s27, 4294966272  ;;  %v1153_v0 = vld [vmem:[%s140_s28 + $0x8] sm:$0xff]  ;;  %v1155_v1 = vld [vmem:[%s140_s28] sm:$0xff]  ;;  %vm449_vm0 = vcmask 64512   ;;  %v1025_v25 = vmov 0.0   ;;  %s748_s21 = sld [smem:[#allocation2]] }
  0x37   : > { %v1157_v2 = vld [vmem:[%s140_s28 + $0x18] sm:$0xff]  ;;  %199 = vmatprep.subr.mxu0 %v1153_v0  ;;  %v1161_v3 = vld [vmem:[%s140_s28 + $0x10] sm:$0xff]  ;;  %v1163_v4 = vld [vmem:[%s140_s28 + $0x28] sm:$0xff]  ;;  %233 = vmatprep.mubr.f32.mxu0 %v1153_v0  ;;  %s160_s29 = scalar_lea.vmem [#allocation6], %s866_s26  ;;  %s878_s30 = sshll.u32 %s1066_s0, 10 }
  0x38   : > { %269 = vmatprep.subr.mxu1 %v1157_v2  ;;  %200 = vmatpush1.xpose.msra.mxu0 %v1155_v1  ;;  %v1167_v5 = vld [vmem:[%s140_s28 + $0x38] sm:$0xff]  ;;  %v1171_v6 = vld [vmem:[%s140_s28 + $0x20] sm:$0xff]  ;;  %v1173_v7 = vld [vmem:[%s140_s28 + $0x30] sm:$0xff]  ;;  %s789_s3 = sshll.u32 %s160_s29, 4  ;;  %s1213_s0 = scalar_lea.hbm %s1252_s2, %s878_s30  ;;  %s790_s3 = int_to_ptr.vmem [resolvable:$true] %s789_s3 }
  0x39   : > { %270 = vmatpush1.xpose.msra.mxu1 %v1161_v3  ;;  %303 = vmatprep.mubr.f32.mxu1 %v1157_v2  ;;  %s775_s6 = scalar_lea.sflag [#allocation5], %s1143_s25  ;;  %s958_s7 = scalar_lea.vmem %s790_s3, 1024 }
  0x3a   : > { %339 = vmatprep.subr.mxu0 %v1163_v4  ;;  %409 = vmatprep.subr.mxu1 %v1167_v5  ;;  %p959_p11 = scmp.ne.s32.totalorder %s790_s3, %s958_s7  ;;  %p1263_p12 = scmp.ne.s32.totalorder %s1257_s22, 0 }
  0x3b   : > { %234 = vmatmul.mubr.f32.vlgmr.msra.gmra.mxu0 %v1155_v1  ;;  %s1026_s8 = smov [#allocation6]  }
  0x3c   : > { %304 = vmatmul.mubr.f32.vlgmr.msra.gmra.mxu1 %v1161_v3  ;;  %340 = vmatpush1.xpose.msra.mxu0 %v1171_v6  ;;  %v749_v29 = vstv %s748_s21  ;;  %p960_p13 = pnand %p959_p11, %p1263_p12  ;;  %s962_s9 = sshll.u32 %s1026_s8, 4  ;;  %s963_s9 = int_to_ptr.vmem [resolvable:$false] %s962_s9 }
  0x3d   : > { %410 = vmatpush1.xpose.msra.mxu1 %v1173_v7  ;;  %373 = vmatprep.mubr.f32.mxu0 %v1163_v4  ;;  %s964_s10 = scalar_lea.vmem %s963_s9, 2048  ;;  %p965_p3 = scmp.lt.s32.totalorder %s790_s3, %s963_s9 }
  0x3e   : > { %443 = vmatprep.mubr.f32.mxu1 %v1167_v5  ;;  %494 = vmatprep.subr.mxu0 %v1153_v0  ;;  %p961_p1 = pneg %p960_p13  ;;  %p966_p5 = scmp.lt.s32.totalorder %s964_s10, %s958_s7 }
  0x3f   : > { %565 = vmatprep.subr.mxu1 %v1157_v2  ;;  %374 = vmatmul.mubr.f32.vlgmr.msra.gmra.mxu0 %v1171_v6 }
  0x40   : > { %444 = vmatmul.mubr.f32.vlgmr.msra.gmra.mxu1 %v1173_v7  ;;  %495 = vmatpush1.msra.mxu0 %v1155_v1  ;;  %p967_p8 = por %p966_p5, %p965_p3 }
  0x41   : > { %566 = vmatpush1.msra.mxu1 %v1161_v3  ;;  %636 = vmatprep.subr.mxu0 %v1163_v4 }
  0x42   : > { %707 = vmatprep.subr.mxu1 %v1167_v5  ;;  %528 = vmatprep.mubr.f32.mxu0 %v1025_v25  ;;  %p968_p10 = pnand %p967_p8, %p961_p1 }
  0x43   : > { %599 = vmatprep.mubr.f32.mxu1 %v1025_v25 }
  0xfb   : > { %v235_v8 = vpop.f32.mrf.mxu0 }
  0xfc   : > { %v305_v9 = vpop.f32.mrf.mxu1 }
  0xfd   : > { %v237_v10 = vpop.f32.mrf.mxu0  ;;  %v306_v12 = vadd.f32 %v305_v9, %v235_v8 }
  0xfe   : > { %v307_v11 = vpop.f32.mrf.mxu1 }
  0xff   : > { %v375_v13 = vpop.f32.mrf.mxu0 }
 0x100   : > { %v445_v14 = vpop.f32.mrf.mxu1  ;;  %v376_v15 = vadd.f32 %v375_v13, %v306_v12 }
 0x101   : > { %v377_v16 = vpop.f32.mrf.mxu0 }
 0x102   : > { %v447_v17 = vpop.f32.mrf.mxu1  ;;  %v446_v18 = vadd.f32 %v445_v14, %v376_v15 }
 0x104   : > { %v450_v19 = vsel %vm449_vm0, %v446_v18, inf }
 0x105   : > { %451 = vmin.xlane.f32.xlu0 %v450_v19 }
 0x18e   : > { %v452_v20 = vpop.xlane.xlu0 %451 }
 0x18f   : > { %v453_v21 = vsub.f32 %v452_v20, %v446_v18 }
 0x191   : > { %v454_v22 = vmul.f32 1.442695, %v453_v21 }
 0x193   : > { %926 = vpow2.f32 %v454_v22 }
 0x1a0   : > { %v927_v23 = vpop.eup %926 }
 0x1a1   : > { %v456_v24 = vsel %vm449_vm0, %v927_v23, 0.0 }
 0x1a2   : > { %457 = vadd.xlane.f32.xlu0 %v456_v24 }
 0x22b   : > { %v458_v26 = vpop.xlane.xlu0 %457 }
 0x22c   : > { %928 = vrcp.f32 %v458_v26 }
 0x239   : > { %v929_v27 = vpop.eup %928 }
 0x23a   : > { %v460_v28 = vmul.f32 %v929_v27, %v927_v23 }
 0x23c   : > { %868 = vmatmul.mubr.msk.f32.vlgmr.msra.gmra.mxu0 %vm449_vm0, %v460_v28  ;;  %869 = vmatmul.mubr.msk.f32.vlgmr.msra.gmra.mxu1 %vm449_vm0, %v460_v28 }
 0x23d   : > { %637 = vmatpush1.msra.mxu0 %v1171_v6  ;;  %708 = vmatpush1.msra.mxu1 %v1173_v7 }
 0x23e   : > { %670 = vmatprep.mubr.f32.mxu0 %v1025_v25  ;;  %741 = vmatprep.mubr.f32.mxu1 %v1025_v25 }
 0x240   : > { %870 = vmatmul.mubr.msk.f32.vlgmr.msra.gmra.mxu0 %vm449_vm0, %v460_v28  ;;  %871 = vmatmul.mubr.msk.f32.vlgmr.msra.gmra.mxu1 %vm449_vm0, %v460_v28 }
 0x2fc   : > { %v530_v30 = vpop.f32.mrf.mxu0  ;;  %v601_v31 = vpop.f32.mrf.mxu1 }
 0x2fd   : > { %v750_v32 = vmul.f32 %v749_v29, %v530_v30  ;;  %v752_v33 = vmul.f32 %v749_v29, %v601_v31 }
 0x2fe   : > { %v532_v34 = vpop.f32.mrf.mxu0  ;;  %v603_v35 = vpop.f32.mrf.mxu1 }
 0x2ff   : > { %v758_v36 = vadd.f32 %v750_v32, %v1155_v1  ;;  %v760_v37 = vadd.f32 %v752_v33, %v1161_v3  ;;  %v751_v38 = vmul.f32 %v749_v29, %v532_v34  ;;  %v753_v39 = vmul.f32 %v749_v29, %v603_v35 }
 0x300   : > { %v672_v40 = vpop.f32.mrf.mxu0  ;;  %v743_v41 = vpop.f32.mrf.mxu1 }
 0x301   : > { %766 = vst [vmem:[%s160_s29] sm:$0xff] %v758_v36  ;;  %768 = vst [vmem:[%s160_s29 + $0x10] sm:$0xff] %v760_v37  ;;  %v759_v42 = vadd.f32 %v751_v38, %v1153_v0  ;;  %v761_v43 = vadd.f32 %v753_v39, %v1157_v2  ;;  %v754_v44 = vmul.f32 %v749_v29, %v672_v40 }
 0x302   : > { %v756_v45 = vmul.f32 %v749_v29, %v743_v41  ;;  %v674_v46 = vpop.f32.mrf.mxu0  ;;  %v745_v47 = vpop.f32.mrf.mxu1 }
 0x303   : > { %767 = vst [vmem:[%s160_s29 + $0x8] sm:$0xff] %v759_v42  ;;  %769 = vst [vmem:[%s160_s29 + $0x18] sm:$0xff] %v761_v43  ;;  %v762_v48 = vadd.f32 %v754_v44, %v1171_v6  ;;  %v755_v50 = vmul.f32 %v749_v29, %v674_v46  ;;  %v757_v51 = vmul.f32 %v749_v29, %v745_v47 }
 0x304   : > { %v764_v49 = vadd.f32 %v756_v45, %v1173_v7 }
 0x305   : > { %770 = vst [vmem:[%s160_s29 + $0x20] sm:$0xff] %v762_v48  ;;  %v763_v52 = vadd.f32 %v755_v50, %v1163_v4  ;;  %v765_v53 = vadd.f32 %v757_v51, %v1167_v5 }
 0x306   : > { %772 = vst [vmem:[%s160_s29 + $0x30] sm:$0xff] %v764_v49 }
 0x307   : > { %771 = vst [vmem:[%s160_s29 + $0x28] sm:$0xff] %v763_v52  ;;  %773 = vst [vmem:[%s160_s29 + $0x38] sm:$0xff] %v765_v53 }
 0x308   : > { %971 = shalt.err (!%p968_p10)
}
 0x309   : > { %s972_s15 = scalar_lea.hbm %s1213_s0, 1024  ;;  %s976_s20 = scalar_lea.hbm %s1252_s2, 2048 }
 0x30a   : > { %p973_p2 = scmp.ne.s32.totalorder %s1213_s0, %s972_s15  ;;  %p977_p7 = scmp.lt.s32.totalorder %s1213_s0, %s1252_s2 }
 0x30b   : > { %p978_p0 = scmp.lt.s32.totalorder %s976_s20, %s972_s15 }
 0x30c   : > { %p974_p4 = pnand %p973_p2, %p1263_p12 }
 0x30d   : > { %p979_p6 = por %p978_p0, %p977_p7 }
 0x30e   : > { %p975_p9 = pneg %p974_p4 }
 0x310   : > { %p980_p11 = pnand %p979_p6, %p975_p9 }
 0x312   : > { %983 = shalt.err (!%p980_p11)
}
 0x313   : > { %881 = dma.vmem_to_hbm [thread:$0]  (%p1263_p12), %s790_s3, 1024, %s1213_s0, %s775_s6  }
 0x314 PF: > { %s801_s26 = sand.u32 1, %s1010_s11   ;;  %p1264_p13 = scmp.ne.s32.totalorder %s1258_s23, 0 }
 0x315   : > { %p1265_p1 = scmp.ge.s32.totalorder %s1022_s14, 2  ;;  %s802_s27 = scalar_lea.sflag [#allocation5], %s801_s26 }
 0x317   : > { %p888_p3 = pnand %p1265_p1, %p1264_p13 }
 0x319   : > { %p889_p5 = pneg %p888_p3 }
 0x31b   : > { %1005 = dma.done.wait (%p889_p5), %s802_s27, 1024  }
 0x31c   : > { %1007 = vsyncadd (%p889_p5), %s802_s27, 4294966272  ;;  %p16_p8 = scmp.ge.s32.totalorder %s1070_s16, 4   ;;  %s1266_s11 = smov %s1014_s12 }
 0x31d   : > { %s1267_s12 = smov %s1018_s13  ;;  %s1268_s13 = smov %s1082_s19 }
 0x31e   : > { %s1269_s14 = smov %s1070_s16  ;;  %18 = sbr.rel (!%p16_p8) target bundleno = 7 (0x7), region = 73 }
 0x323   :  { %807 = vsyncpa [#allocation4], 1 }
 0x324   :  { %809 = vsyncpa [#allocation4 + $0x1], 1 }
 0x325   :  { %810 = vsyncpa [#allocation5], 1 }
 0x326   :  { %812 = vsyncpa [#allocation5 + $0x1], 1 }

</bundles_post_ra>
